<compile_context>
chip_gen: v7x
topology: tpu7x:2x2x1
jax: 0.10.0
libtpu: 0.0.40
codegen_flags: <defaults>
</compile_context>

<pallas_src>
import jax
import jax.numpy as jnp
from jax.experimental import pallas as pl
from jax.experimental.pallas import tpu as pltpu

EPS = 1e-5  # torch.nn.LayerNorm default


def _patch_merge_kernel(x_ref, w_ref, b_ref, o_ref):
    """Fused 2x2 merge + LayerNorm(4C) + Linear(4C -> 2C, no bias).

    x_ref : (TI, 2, Whp, 2C)  TI row-pairs; dim 1 = even / odd image row.
                              even row carries [x0 | x2], odd row [x1 | x3].
    w_ref : (2, 2C, N)        LN-gamma-folded, half-permuted reduction weight.
    b_ref : (1, N)            folded bias (beta @ W_red.T).
    o_ref : (TI, Whp, N)      Whp may be padded past W/2; padded rows are
                              garbage-in and masked by Pallas on the store.
    """
    ti, _, whp, c2 = x_ref.shape
    n = o_ref.shape[-1]
    rows = ti * whp
    n4 = 2 * c2                      # full LayerNorm width (4C)

    # Whp is a multiple of 8 by construction -> layout-free flatten after the
    # f32 cast (f32 sublane packing is 8).
    h0 = x_ref[:, 0, :, :].astype(jnp.float32).reshape(rows, c2)   # [x0 | x2]
    h1 = x_ref[:, 1, :, :].astype(jnp.float32).reshape(rows, c2)   # [x1 | x3]

    # Two-pass LayerNorm statistics over the 4C feature (both halves).
    mean = (jnp.sum(h0, axis=-1, keepdims=True)
            + jnp.sum(h1, axis=-1, keepdims=True)) * (1.0 / n4)
    d0 = h0 - mean
    d1 = h1 - mean
    var = (jnp.sum(d0 * d0, axis=-1, keepdims=True)
           + jnp.sum(d1 * d1, axis=-1, keepdims=True)) * (1.0 / n4)
    inv = jax.lax.rsqrt(var + EPS)

    mm_dtype = w_ref.dtype           # bf16 weights feed the MXU natively
    y0 = (d0 * inv).astype(mm_dtype)
    y1 = (d1 * inv).astype(mm_dtype)

    acc = jnp.dot(y0, w_ref[0], preferred_element_type=jnp.float32)
    acc = acc + jnp.dot(y1, w_ref[1], preferred_element_type=jnp.float32)
    acc = acc + b_ref[...].astype(jnp.float32)

    o_ref[...] = acc.reshape(ti, whp, n).astype(o_ref.dtype)


def _pick_row_pair_tile(bh2, whp, c2, n, act_item, w_item, vmem_budget_bytes,
                        max_rows=4096):
    """Largest row-pair tile TI dividing bh2 that fits the VMEM budget.

    Budget covers the double-buffered pipeline copies of input/output/weights
    PLUS the in-kernel f32/mm-dtype temporaries (h0/h1, y0/y1, f32 acc).
    """
    def live_bytes(ti):
        rows = ti * whp
        in_block = rows * 2 * c2 * act_item            # (TI, 2, Whp, 2C)
        out_block = rows * n * act_item                # (TI, Whp, N)
        weights = 2 * c2 * n * w_item + n * 4          # fused weight + f32 bias
        pipelined = 2 * (in_block + out_block + weights)
        temps = 2 * rows * c2 * (4 + w_item) + rows * n * 4
        return pipelined + temps

    divisors = [d for d in range(1, bh2 + 1) if bh2 % d == 0]
    fitting = [d for d in divisors
               if d * whp <= max_rows and live_bytes(d) <= vmem_budget_bytes]
    if not fitting:
        return 1
    best = max(fitting)
    if (bh2 // best) % 2 == 0:
        return best
    # Prefer an even number of grid steps (v7x: 2 TCs split the "parallel"
    # axis) as long as the tile stays at least ~half as large.
    thresh = min(best * whp // 2, 1024)
    even = [d for d in fitting if (bh2 // d) % 2 == 0 and d * whp >= thresh]
    return max(even) if even else best


def patch_merging_forward(x, params, input_resolution, *, matmul_dtype=None):
    """x: (B, H*W, C) -> (B, (H/2)*(W/2), 2C).  Mirrors PatchMerging.forward."""
    h, w = input_resolution
    b, seq_len, c = x.shape
    assert seq_len == h * w, "input feature has wrong size"
    assert h % 2 == 0 and w % 2 == 0, f"x size ({h}*{w}) are not even."

    bh2 = b * (h // 2)               # row pairs (grid axis)
    wh = w // 2                      # output pixels per row pair
    whp = ((wh + 7) // 8) * 8        # sublane-padded block extent (layout-free flatten)
    c2 = 2 * c                       # channels per half (col-pair packed)
    n = 2 * c                        # output channels
    if matmul_dtype is None:
        # Keep module semantics for f32 inputs; pass jnp.bfloat16 (and feed
        # bf16 activations from the producer) when the tolerance allows it.
        matmul_dtype = x.dtype

    # Free, contiguous reshape: (B, H*W, C) -> (B*H/2, 2, W/2, 2C).
    #   x7[p, 0, j] = [x(2i, 2j)   | x(2i, 2j+1)  ] = [x0 | x2] channels
    #   x7[p, 1, j] = [x(2i+1, 2j) | x(2i+1, 2j+1)] = [x1 | x3] channels
    x7 = x.reshape(bh2, 2, wh, c2)

    # Fold LayerNorm affine into the reduction weight; permute its rows from
    # the torch channel order [x0|x1|x2|x3] to the in-memory order of the halves.
    w_red = params["reduction_weight"].T.astype(jnp.float32)        # (4C, 2C)
    gamma = params["norm_weight"].astype(jnp.float32)[:, None]      # (4C, 1)
    beta = params["norm_bias"].astype(jnp.float32)                  # (4C,)
    a = gamma * w_red                                               # (4C, N)
    w_even = jnp.concatenate([a[0 * c:1 * c], a[2 * c:3 * c]], axis=0)  # [x0|x2] rows
    w_odd = jnp.concatenate([a[1 * c:2 * c], a[3 * c:4 * c]], axis=0)   # [x1|x3] rows
    w_fused = jnp.stack([w_even, w_odd], axis=0).astype(matmul_dtype)   # (2, 2C, N)
    b_fused = (beta @ w_red).reshape(1, n).astype(jnp.float32)          # (1, N)

    act_item = jnp.dtype(x.dtype).itemsize
    w_item = jnp.dtype(matmul_dtype).itemsize

    # Generation-aware VMEM limits (64 MiB/core on v7x, 128 MiB on v5e/v6e).
    try:
        vmem_cap = int(pltpu.get_tpu_info().vmem_capacity_bytes)
    except Exception:
        vmem_cap = 0
    if vmem_cap < (32 << 20):
        vmem_cap = 64 << 20          # conservative (v7x per-core) fallback
    tile_budget = vmem_cap // 2
    vmem_limit = min((vmem_cap * 3) // 4, 110 << 20)

    ti = _pick_row_pair_tile(bh2, whp, c2, n, act_item, w_item, tile_budget)
    grid = (bh2 // ti,)

    rows_total = bh2 * wh
    cost = pl.CostEstimate(
        flops=2 * rows_total * (2 * c2) * n,
        transcendentals=rows_total,
        bytes_accessed=rows_total * (2 * c2 + n) * act_item + 2 * c2 * n * w_item,
    )

    out = pl.pallas_call(
        _patch_merge_kernel,
        out_shape=jax.ShapeDtypeStruct((bh2, wh, n), x.dtype),
        grid=grid,
        in_specs=[
            # One contiguous block (Pallas clamps the DMA when whp > wh).
            pl.BlockSpec((ti, 2, whp, c2), lambda i: (i, 0, 0, 0)),
            pl.BlockSpec((2, c2, n), lambda i: (0, 0, 0)),   # fused weight (const)
            pl.BlockSpec((1, n), lambda i: (0, 0)),          # fused bias   (const)
        ],
        out_specs=pl.BlockSpec((ti, whp, n), lambda i: (i, 0, 0)),
        compiler_params=pltpu.CompilerParams(
            dimension_semantics=("parallel",),
            vmem_limit_bytes=vmem_limit,
        ),
        cost_estimate=cost,
    )(x7, w_fused, b_fused)

    return out.reshape(b, (h // 2) * wh, n)


def init_params(key, dim):
    """Deterministic synthetic parameters matching the torch module's shapes."""
    k_w, k_g, k_b = jax.random.split(key, 3)
    # nn.Linear(4*dim, 2*dim, bias=False): weight shape (2*dim, 4*dim)
    reduction_weight = (
        jax.random.normal(k_w, (2 * dim, 4 * dim), dtype=jnp.float32) * 0.02
    )
    # nn.LayerNorm(4*dim): perturbed so the affine folding is exercised.
    norm_weight = 1.0 + 0.1 * jax.random.normal(k_g, (4 * dim,), dtype=jnp.float32)
    norm_bias = 0.1 * jax.random.normal(k_b, (4 * dim,), dtype=jnp.float32)
    return {
        "reduction_weight": reduction_weight,
        "norm_weight": norm_weight,
        "norm_bias": norm_bias,
    }


def _reference(x, params, input_resolution):
    """Pure-JAX reference mirroring the PyTorch forward (torch cat order)."""
    h, w = input_resolution
    b, seq_len, c = x.shape
    xg = x.reshape(b, h, w, c)
    x0 = xg[:, 0::2, 0::2, :]
    x1 = xg[:, 1::2, 0::2, :]
    x2 = xg[:, 0::2, 1::2, :]
    x3 = xg[:, 1::2, 1::2, :]
    m = jnp.concatenate([x0, x1, x2, x3], axis=-1).reshape(b, -1, 4 * c)
    mean = jnp.mean(m, axis=-1, keepdims=True)
    var = jnp.mean((m - mean) ** 2, axis=-1, keepdims=True)
    y = (m - mean) / jnp.sqrt(var + EPS)
    y = y * params["norm_weight"] + params["norm_bias"]
    return y @ params["reduction_weight"].T


if __name__ == "__main__":
    key = jax.random.PRNGKey(0)
    k_x1, k_x2, k_p = jax.random.split(key, 3)

    C = 32
    params = init_params(k_p, C)

    # Case 1: W/2 = 8 (multiple of the sublane packing) — fully contiguous DMA.
    B, H, W = 2, 16, 16
    x1 = jax.random.normal(k_x1, (B, H * W, C), dtype=jnp.float32)
    out1 = jax.block_until_ready(patch_merging_forward(x1, params, (H, W)))
    ref1 = _reference(x1, params, (H, W))
    assert out1.shape == (B, (H // 2) * (W // 2), 2 * C), out1.shape
    err1 = float(jnp.max(jnp.abs(out1 - ref1)))
    assert jnp.allclose(out1, ref1, atol=1e-3, rtol=1e-3), err1

    # Case 2: W/2 = 14 (realistic Swin, not a multiple of 8) — exercises the
    # padded-sublane path that replaces the old TI=1 fallback.
    B2, H2, W2 = 2, 28, 28
    x2 = jax.random.normal(k_x2, (B2, H2 * W2, C), dtype=jnp.float32)
    out2 = jax.block_until_ready(patch_merging_forward(x2, params, (H2, W2)))
    ref2 = _reference(x2, params, (H2, W2))
    assert out2.shape == (B2, (H2 // 2) * (W2 // 2), 2 * C), out2.shape
    err2 = float(jnp.max(jnp.abs(out2 - ref2)))
    assert jnp.allclose(out2, ref2, atol=1e-3, rtol=1e-3), err2

    print("KERNEL_OK")
</pallas_src>

<mosaic_0001>
module attributes {stable_mosaic.version = 11 : i64} {
  func.func @_patch_merge_kernel(%arg0: i32, %arg1: memref<8x2x8x64xf32, #tpu.memory_space<vmem>>, %arg2: memref<2x64x64xf32, #tpu.memory_space<vmem>>, %arg3: memref<1x64xf32, #tpu.memory_space<vmem>>, %arg4: memref<8x8x64xf32, #tpu.memory_space<vmem>>) attributes {dimension_semantics = [#tpu.dimension_semantics<parallel>], iteration_bounds = array<i64: 2>, scalar_prefetch = 0 : i64, scratch_operands = 0 : i64, tpu.core_type = #tpu.core_type<tc>, window_params = [{transform_indices = @transform_0, window_bounds = array<i64: 8, 2, 8, 64>}, {pipeline_mode = #tpu.pipeline_mode<synchronous>, transform_indices = @transform_1, window_bounds = array<i64: 2, 64, 64>}, {pipeline_mode = #tpu.pipeline_mode<synchronous>, transform_indices = @transform_2, window_bounds = array<i64: 1, 64>}, {transform_indices = @transform_3, window_bounds = array<i64: 8, 8, 64>}]} {
    %c0 = arith.constant 0 : index
    %c0_0 = arith.constant 0 : index
    %c0_1 = arith.constant 0 : index
    %c0_2 = arith.constant 0 : index
    %0 = vector.load %arg1[%c0, %c0_0, %c0_1, %c0_2] : memref<8x2x8x64xf32, #tpu.memory_space<vmem>>, vector<8x1x8x64xf32>
    %1 = vector.shape_cast %0 : vector<8x1x8x64xf32> to vector<8x8x64xf32>
    %2 = vector.shape_cast %1 : vector<8x8x64xf32> to vector<64x64xf32>
    %c0_3 = arith.constant 0 : index
    %c1 = arith.constant 1 : index
    %c0_4 = arith.constant 0 : index
    %c0_5 = arith.constant 0 : index
    %3 = vector.load %arg1[%c0_3, %c1, %c0_4, %c0_5] : memref<8x2x8x64xf32, #tpu.memory_space<vmem>>, vector<8x1x8x64xf32>
    %4 = vector.shape_cast %3 : vector<8x1x8x64xf32> to vector<8x8x64xf32>
    %5 = vector.shape_cast %4 : vector<8x8x64xf32> to vector<64x64xf32>
    %cst = arith.constant dense<0.000000e+00> : vector<64xf32>
    %6 = vector.multi_reduction <add>, %2, %cst [1] : vector<64x64xf32> to vector<64xf32>
    %7 = vector.shape_cast %6 : vector<64xf32> to vector<64x1xf32>
    %cst_6 = arith.constant dense<0.000000e+00> : vector<64xf32>
    %8 = vector.multi_reduction <add>, %5, %cst_6 [1] : vector<64x64xf32> to vector<64xf32>
    %9 = vector.shape_cast %8 : vector<64xf32> to vector<64x1xf32>
    %10 = arith.addf %7, %9 : vector<64x1xf32>
    %cst_7 = arith.constant 7.812500e-03 : f32
    %11 = vector.broadcast %cst_7 : f32 to vector<64x1xf32>
    %12 = arith.mulf %10, %11 : vector<64x1xf32>
    %13 = vector.broadcast %12 : vector<64x1xf32> to vector<64x64xf32>
    %14 = arith.subf %2, %13 : vector<64x64xf32>
    %15 = vector.broadcast %12 : vector<64x1xf32> to vector<64x64xf32>
    %16 = arith.subf %5, %15 : vector<64x64xf32>
    %17 = arith.mulf %14, %14 : vector<64x64xf32>
    %cst_8 = arith.constant dense<0.000000e+00> : vector<64xf32>
    %18 = vector.multi_reduction <add>, %17, %cst_8 [1] : vector<64x64xf32> to vector<64xf32>
    %19 = vector.shape_cast %18 : vector<64xf32> to vector<64x1xf32>
    %20 = arith.mulf %16, %16 : vector<64x64xf32>
    %cst_9 = arith.constant dense<0.000000e+00> : vector<64xf32>
    %21 = vector.multi_reduction <add>, %20, %cst_9 [1] : vector<64x64xf32> to vector<64xf32>
    %22 = vector.shape_cast %21 : vector<64xf32> to vector<64x1xf32>
    %23 = arith.addf %19, %22 : vector<64x1xf32>
    %cst_10 = arith.constant 7.812500e-03 : f32
    %24 = vector.broadcast %cst_10 : f32 to vector<64x1xf32>
    %25 = arith.mulf %23, %24 : vector<64x1xf32>
    %cst_11 = arith.constant 9.99999974E-6 : f32
    %26 = vector.broadcast %cst_11 : f32 to vector<64x1xf32>
    %27 = arith.addf %25, %26 : vector<64x1xf32>
    %28 = math.rsqrt %27 : vector<64x1xf32>
    %29 = vector.broadcast %28 : vector<64x1xf32> to vector<64x64xf32>
    %30 = arith.mulf %14, %29 : vector<64x64xf32>
    %31 = vector.broadcast %28 : vector<64x1xf32> to vector<64x64xf32>
    %32 = arith.mulf %16, %31 : vector<64x64xf32>
    %c0_12 = arith.constant 0 : index
    %c0_13 = arith.constant 0 : index
    %c0_14 = arith.constant 0 : index
    %33 = vector.load %arg2[%c0_12, %c0_13, %c0_14] : memref<2x64x64xf32, #tpu.memory_space<vmem>>, vector<1x64x64xf32>
    %34 = vector.shape_cast %33 : vector<1x64x64xf32> to vector<64x64xf32>
    %cst_15 = arith.constant dense<0.000000e+00> : vector<64x64xf32>
    %35 = tpu.matmul %30, %34, %cst_15 {dimension_numbers = #tpu.dot_dimension_numbers<[1], [0], [0], [1], [0, 0, 1, 1], [], []>} : vector<64x64xf32>, vector<64x64xf32>, vector<64x64xf32> -> vector<64x64xf32>
    %c1_16 = arith.constant 1 : index
    %c0_17 = arith.constant 0 : index
    %c0_18 = arith.constant 0 : index
    %36 = vector.load %arg2[%c1_16, %c0_17, %c0_18] : memref<2x64x64xf32, #tpu.memory_space<vmem>>, vector<1x64x64xf32>
    %37 = vector.shape_cast %36 : vector<1x64x64xf32> to vector<64x64xf32>
    %cst_19 = arith.constant dense<0.000000e+00> : vector<64x64xf32>
    %38 = tpu.matmul %32, %37, %cst_19 {dimension_numbers = #tpu.dot_dimension_numbers<[1], [0], [0], [1], [0, 0, 1, 1], [], []>} : vector<64x64xf32>, vector<64x64xf32>, vector<64x64xf32> -> vector<64x64xf32>
    %39 = arith.addf %35, %38 : vector<64x64xf32>
    %c0_20 = arith.constant 0 : index
    %c0_21 = arith.constant 0 : index
    %40 = vector.load %arg3[%c0_20, %c0_21] : memref<1x64xf32, #tpu.memory_space<vmem>>, vector<1x64xf32>
    %41 = vector.broadcast %40 : vector<1x64xf32> to vector<64x64xf32>
    %42 = arith.addf %39, %41 : vector<64x64xf32>
    %43 = vector.shape_cast %42 : vector<64x64xf32> to vector<8x8x64xf32>
    %c0_22 = arith.constant 0 : index
    %c0_23 = arith.constant 0 : index
    %c0_24 = arith.constant 0 : index
    %44 = vector.load %arg4[%c0_22, %c0_23, %c0_24] : memref<8x8x64xf32, #tpu.memory_space<vmem>>, vector<8x8x64xf32>
    tpu.vector_store %arg4[%c0_22, %c0_23, %c0_24], %43 {strides = array<i32>} : memref<8x8x64xf32, #tpu.memory_space<vmem>>, vector<8x8x64xf32>,
    return
  }
  func.func @transform_0(%arg0: i32) -> (i32, i32, i32, i32) {
    %c0_i32 = arith.constant 0 : i32
    %c0_i32_0 = arith.constant 0 : i32
    %c0_i32_1 = arith.constant 0 : i32
    %c0_i32_2 = arith.constant 0 : i32
    return %arg0, %c0_i32, %c0_i32_0, %c0_i32_1 : i32, i32, i32, i32
  }
  func.func @transform_1(%arg0: i32) -> (i32, i32, i32) {
    %c0_i32 = arith.constant 0 : i32
    %c0_i32_0 = arith.constant 0 : i32
    %c0_i32_1 = arith.constant 0 : i32
    %c0_i32_2 = arith.constant 0 : i32
    return %c0_i32, %c0_i32_0, %c0_i32_1 : i32, i32, i32
  }
  func.func @transform_2(%arg0: i32) -> (i32, i32) {
    %c0_i32 = arith.constant 0 : i32
    %c0_i32_0 = arith.constant 0 : i32
    %c0_i32_1 = arith.constant 0 : i32
    return %c0_i32, %c0_i32_0 : i32, i32
  }
  func.func @transform_3(%arg0: i32) -> (i32, i32, i32) {
    %c0_i32 = arith.constant 0 : i32
    %c0_i32_0 = arith.constant 0 : i32
    %c0_i32_1 = arith.constant 0 : i32
    return %arg0, %c0_i32, %c0_i32_0 : i32, i32, i32
  }
}

</mosaic_0001>

<bundles_post_ra>
// kernel: tpu_custom_call.1
= control target key start
LH: loop header
LB: loop body
LE: loop exit
PB: predicated region body
PF: predicated region fallthrough
CT: control target
= control target key end

     0   :  { %8 = vsyncpa [#allocation3], 0  ;;  %s1639_s0 = inlined_call_operand.hbm [shape: f32[16,2,8,64], index: 0, kind: input, shape index: {}]   ;;  %s1640_s1 = inlined_call_operand.hbm [shape: f32[2,64,64], index: 1, kind: input, shape index: {}]   ;;  %s1641_s2 = inlined_call_operand.vmem [shape: f32[1,64], index: 2, kind: input, shape index: {}]   ;;  %s1642_s3 = inlined_call_operand.hbm [shape: f32[16,8,64], index: 3, kind: output, shape index: {}]  }
   0x1   :  { %10 = vsyncpa [#allocation3 + $0x1], 0 }
   0x2   :  { %11 = vsyncpa [#allocation6], 0 }
   0x3   :  { %12 = vsyncpa [#allocation4], 0 }
   0x4   :  { %14 = vsyncpa [#allocation4 + $0x1], 0  ;;  %s1219_s12 = smov 0   ;;  %s1221_s13 = smov 0  }
   0x5   :  { %s1223_s14 = smov 0   ;;  %s1225_s15 = smov 0  }
   0x6 LB: > { %s1240_s16 = sadd.s32 4294967295, %s1190_s15   ;;  %s812_s17 = sadd.s32 4294967294, %s1190_s15   ;;  %s1190_s15 = sphi %s1225_s15, %s1662_s15   ;;  %s1186_s14 = sphi %s1223_s14, %s1661_s14   ;;  %s1182_s13 = sphi %s1221_s13, %s1660_s13   ;;  %s1178_s12 = sphi %s1219_s12, %s1659_s12  }
   0x7   : > { %p40_p0 = scmp.ne.s32.totalorder %s1182_s13, %s1178_s12  ;;  %p1643_p1 = scmp.eq.s32.totalorder %s1240_s16, 0 }
   0x8   : > { %p112_p3 = scmp.eq.s32.totalorder %s812_s17, 1  ;;  %p813_p5 = scmp.ge.s32.totalorder %s1190_s15, 1 }
   0x9   : > { %p1249_p4 = por %p1643_p1, %p40_p0  ;;  %p119_p7 = scmp.lt.s32.totalorder %s1190_s15, 3 }
   0xa   : > { %p1254_p6 = por %p112_p3, %p40_p0  ;;  %s1192_s21 = smov [#allocation5]  }
   0xb   : > { %s1646_s18 = scalar_select %p1249_p4, 1, 0 }
   0xc   : > { %s1647_s19 = scalar_select %p1254_p6, 1, 0 }
   0xd   : > { %p1259_p8 = pnand %p813_p5, %p119_p7  ;;  %s131_s22 = sshll.u32 %s1192_s21, 4  ;;  %s1263_s22 = int_to_ptr.vmem [resolvable:$true] %s131_s22 }
   0xe   : > { %s1275_s24 = sadd.s32 1, %s1190_s15   ;;  %s27_s25 = sadd.s32 1, %s1186_s14 }
   0xf   : > { %s1648_s20 = scalar_select %p1259_p8, 1, 0 }
  0x10   : > { %p993_p9 = pneg %p1259_p8  ;;  %s24_s26 = ssub.s32 %s1190_s15, %s1275_s24 }
  0x11   : > { %s1062_s29 = scalar_lea.hbm %s1640_s1, 2048 }
  0x12   : > { %p1270_p11 = pnand %p993_p9, %p1643_p1  ;;  %p1063_p12 = scmp.ne.s32.totalorder %s1640_s1, %s1062_s29 }
  0x13   : > { %p1069_p5 = scmp.lt.u32.totalorder %s1062_s29, %s1640_s1 }
  0x14   : > { %p1064_p13 = pneg %p1270_p11 }
  0x16   : > { %p1065_p0 = pnand %p1064_p13, %p1063_p12 }
  0x18   : > { %p1066_p3 = pneg %p1065_p0 }
  0x1a   : > { %p1071_p7 = pnand %p1069_p5, %p1066_p3 }
  0x1c   : > { %1074 = shalt.err (!%p1071_p7)
}
  0x1d   : > { %s1075_s7 = scalar_lea.vmem %s1263_s22, 2048  ;;  %p1083_p2 = scmp.lt.s32.totalorder %s1263_s22, %s1263_s22 }
  0x1e   : > { %p1076_p9 = scmp.ne.s32.totalorder %s1263_s22, %s1075_s7  ;;  %p1084_p6 = scmp.lt.s32.totalorder %s1075_s7, %s1075_s7 }
  0x20   : > { %p1078_p10 = pnand %p1076_p9, %p1064_p13  ;;  %p1085_p4 = por %p1084_p6, %p1083_p2 }
  0x22   : > { %p1079_p1 = pneg %p1078_p10 }
  0x24   : > { %p1086_p8 = pnand %p1085_p4, %p1079_p1 }
  0x26   : > { %1089 = shalt.err (!%p1086_p8)
}
  0x27   : > { %s1193_s8 = smov 128   ;;  %s1194_s9 = smov 8  }
  0x28   : > { %996 = dma.hbm_to_vmem [thread:$0]  (!%p1270_p11), %s1640_s1, 2048, %s1263_s22, [#allocation6], %s1193_s8, %s1193_s8, %s1194_s9  }
  0x29   : > { %p25_p1 = scmp.eq.s32.totalorder %s24_s26, 0  ;;  %p34_p2 = scmp.ne.s32.totalorder %s1186_s14, %s1182_s13 }
  0x2a   : > { %p35_p4 = scmp.eq.s32.totalorder %s1190_s15, 0  ;;  %p1006_p6 = scmp.lt.s32.totalorder %s1190_s15, 2 }
  0x2b   : > { %s1309_s17 = scalar_select %p25_p1, %s1186_s14, %s27_s25  }
  0x2c   : > { %p36_p8 = por %p35_p4, %p34_p2  ;;  %p1650_p10 = scmp.eq.s32.totalorder %s1240_s16, 1 }
  0x2d   : > { %s148_s23 = sand.u32 1, %s1186_s14   ;;  %s855_s27 = sshll.u32 %s1190_s15, 11 }
  0x2e   : > { %p1313_p12 = por %p1650_p10, %p34_p2  ;;  %s816_s28 = sshll.u32 %s148_s23, 7 }
  0x2f   : > { %s1322_s4 = scalar_lea.hbm %s1639_s0, %s855_s27  ;;  %s152_s22 = scalar_lea.vmem [#allocation2], %s816_s28 }
  0x30   : > { %s160_s25 = sshll.u32 %s152_s22, 4  ;;  %p1324_p11 = pnand %p1006_p6, %p36_p8  ;;  %s1328_s25 = int_to_ptr.vmem [resolvable:$true] %s160_s25 }
  0x31   : > { %s1330_s5 = scalar_lea.sflag [#allocation3], %s148_s23  ;;  %s1090_s6 = scalar_lea.hbm %s1322_s4, 2048 }
  0x32   : > { %p1091_p13 = scmp.ne.s32.totalorder %s1322_s4, %s1090_s6  ;;  %p1092_p0 = pneg %p1324_p11 }
  0x33   : > { %s1095_s11 = scalar_lea.hbm %s1639_s0, 4096  ;;  %p1096_p7 = scmp.lt.u32.totalorder %s1322_s4, %s1639_s0 }
  0x34   : > { %p1093_p3 = pnand %p1092_p0, %p1091_p13  ;;  %p1097_p9 = scmp.lt.u32.totalorder %s1095_s11, %s1090_s6 }
  0x35   : > { %p1099_p2 = scmp.lt.u32.totalorder %s1090_s6, %s1322_s4 }
  0x36   : > { %p1094_p5 = pneg %p1093_p3  ;;  %p1098_p1 = por %p1097_p9, %p1096_p7 }
  0x38   : > { %p1100_p4 = por %p1099_p2, %p1098_p1 }
  0x3a   : > { %p1101_p6 = pnand %p1100_p4, %p1094_p5 }
  0x3c   : > { %1104 = shalt.err (!%p1101_p6)
}
  0x3d   : > { %s1105_s23 = scalar_lea.vmem %s1328_s25, 2048  ;;  %s1195_s29 = smov [#allocation2]  }
  0x3e   : > { %p1106_p8 = scmp.ne.s32.totalorder %s1328_s25, %s1105_s23  ;;  %s1110_s30 = sshll.u32 %s1195_s29, 4  ;;  %s1111_s30 = int_to_ptr.vmem [resolvable:$false] %s1110_s30 }
  0x3f   : > { %s1112_s22 = scalar_lea.vmem %s1111_s30, 4096  ;;  %p1113_p3 = scmp.lt.s32.totalorder %s1328_s25, %s1111_s30 }
  0x40   : > { %p1108_p10 = pnand %p1106_p8, %p1092_p0  ;;  %p1114_p7 = scmp.lt.s32.totalorder %s1112_s22, %s1105_s23 }
  0x42   : > { %p1109_p13 = pneg %p1108_p10  ;;  %p1115_p9 = por %p1114_p7, %p1113_p3 }
  0x44   : > { %p1116_p1 = pnand %p1115_p9, %p1109_p13 }
  0x46   : > { %1119 = shalt.err (!%p1116_p1)
}
  0x47   : > { %1000 = dma.hbm_to_vmem [thread:$0]  (!%p1324_p11), %s1322_s4, 2048, %s1328_s25, %s1330_s5, %s1193_s8, %s1193_s8, %s1194_s9  }
  0x48   : > { %p1653_p0 = scmp.ne.s32.totalorder %s1648_s20, 0 }
  0x49   : > { %s1364_s6 = sand.u32 (!%p1653_p0), 1, %s1182_s13   ;;  %p1654_p5 = scmp.ne.s32.totalorder (!%p1653_p0), %s1646_s18, 0 }
  0x4a   : > { %172 = sbr.rel (%p1653_p0) target bundleno = 663 (0x297), region = 32  ;;  %s821_s7 = sshll.u32 (!%p1653_p0), %s1364_s6, 7 }
  0x4b   : > { %s175_s10 = scalar_lea.sflag (!%p1653_p0), [#allocation3], %s1364_s6  ;;  %s1368_s11 = scalar_lea.vmem (!%p1653_p0), [#allocation2], %s821_s7 }
  0x51   : > { %1165 = dma.done.wait (%p1654_p5), %s175_s10, 2048  }
  0x52   : > { %1167 = vsyncadd (%p1654_p5), %s175_s10, 4294965248  ;;  %p1655_p11 = scmp.eq.s32.totalorder %s1240_s16, 0 }
  0x54   : > { %1169 = dma.done.wait (%p1655_p11), [#allocation6], 2048   ;;  %p1656_p2 = pmov %p1655_p11 }
  0x55   : > { %vm224_vm0 = vcmask 523264   ;;  %v208_v0 = vld [vmem:[%s1368_s11 + $0x10] sm:$0xff]  ;;  %v207_v1 = vld [vmem:[%s1368_s11] sm:$0xff]  ;;  %v825_v2 = vld [vmem:[%s1368_s11 + $0x18] sm:$0xff]  ;;  %s823_s18 = sshll.u32 %s1364_s6, 6  ;;  %s856_s4 = sshll.u32 %s1240_s16, 10 }
  0x56   : > { %1171 = vsyncadd (%p1656_p2), [#allocation6], 4294965248  ;;  %v228_v3 = vsel %vm224_vm0, %v208_v0, 0.0  ;;  %v225_v4 = vsel %vm224_vm0, %v207_v1, 0.0  ;;  %v824_v5 = vld [vmem:[%s1368_s11 + $0x8] sm:$0xff]  ;;  %v252_v6 = vsel %vm224_vm0, %v825_v2, 0.0  ;;  %s1589_s27 = scalar_lea.hbm %s1642_s3, %s856_s4 }
  0x57   : > { %229 = vadd.xlane.f32.xlu1 %v228_v3  ;;  %226 = vadd.xlane.f32.xlu0 %v225_v4  ;;  %v249_v7 = vsel %vm224_vm0, %v824_v5, 0.0  ;;  %v1387_v8 = vld [vmem:[%s1368_s11 + $0x28] sm:$0xff]  ;;  %v209_v9 = vld [vmem:[%s1368_s11 + $0x20] sm:$0xff]  ;;  %v1394_v12 = vld [vmem:[%s1368_s11 + $0x38] sm:$0xff]  ;;  %s1570_s9 = scalar_lea.vmem [#allocation7], %s823_s18  ;;  %s716_s16 = scalar_lea.sflag [#allocation4], %s1364_s6 }
  0x58   : > { %v255_v10 = vsel %vm224_vm0, %v1387_v8, 0.0  ;;  %v231_v11 = vsel %vm224_vm0, %v209_v9, 0.0  ;;  %v1397_v13 = vld [vmem:[%s1368_s11 + $0x30] sm:$0xff]  ;;  %v258_v14 = vsel %vm224_vm0, %v1394_v12, 0.0  ;;  %v1404_v16 = vld [vmem:[%s1368_s11 + $0x48] sm:$0xff]  ;;  %v1407_v17 = vld [vmem:[%s1368_s11 + $0x40] sm:$0xff] }
  0x59   : > { %v234_v15 = vsel %vm224_vm0, %v1397_v13, 0.0  ;;  %v261_v18 = vsel %vm224_vm0, %v1404_v16, 0.0  ;;  %v237_v19 = vsel %vm224_vm0, %v1407_v17, 0.0  ;;  %v1414_v20 = vld [vmem:[%s1368_s11 + $0x58] sm:$0xff]  ;;  %v1417_v21 = vld [vmem:[%s1368_s11 + $0x50] sm:$0xff]  ;;  %v1424_v24 = vld [vmem:[%s1368_s11 + $0x68] sm:$0xff] }
  0x5a   : > { %v264_v22 = vsel %vm224_vm0, %v1414_v20, 0.0  ;;  %v240_v23 = vsel %vm224_vm0, %v1417_v21, 0.0  ;;  %v1427_v25 = vld [vmem:[%s1368_s11 + $0x60] sm:$0xff]  ;;  %v267_v26 = vsel %vm224_vm0, %v1424_v24, 0.0  ;;  %v1434_v28 = vld [vmem:[%s1368_s11 + $0x78] sm:$0xff]  ;;  %v1437_v29 = vld [vmem:[%s1368_s11 + $0x70] sm:$0xff] }
  0x5b   : > { %253 = vadd.xlane.f32.xlu1 %v252_v6  ;;  %250 = vadd.xlane.f32.xlu0 %v249_v7  ;;  %v243_v27 = vsel %vm224_vm0, %v1427_v25, 0.0  ;;  %v270_v30 = vsel %vm224_vm0, %v1434_v28, 0.0  ;;  %v246_v31 = vsel %vm224_vm0, %v1437_v29, 0.0  ;;  %s729_s25 = sshll.u32 %s1570_s9, 4  ;;  %s1196_s23 = smov [#allocation7]   ;;  %s1591_s25 = int_to_ptr.vmem [resolvable:$true] %s729_s25 }
  0x5c   : > { %s1120_s28 = scalar_lea.vmem %s1591_s25, 1024  ;;  %s1124_s29 = sshll.u32 %s1196_s23, 4  ;;  %s1125_s29 = int_to_ptr.vmem [resolvable:$false] %s1124_s29 }
  0x5d   : > { %p1121_p4 = scmp.ne.s32.totalorder %s1591_s25, %s1120_s28  ;;  %s1126_s30 = scalar_lea.vmem %s1125_s29, 2048 }
  0x5e   : > { %p1127_p10 = scmp.lt.s32.totalorder %s1591_s25, %s1125_s29  ;;  %p1128_p13 = scmp.lt.s32.totalorder %s1126_s30, %s1120_s28 }
  0x5f   : > { %256 = vadd.xlane.f32.xlu1 %v255_v10  ;;  %232 = vadd.xlane.f32.xlu0 %v231_v11  ;;  %p1122_p6 = pnand %p1121_p4, %p1313_p12 }
  0x60   : > { %p1129_p3 = por %p1128_p13, %p1127_p10 }
  0x61   : > { %p1123_p8 = pneg %p1122_p6 }
  0x63   : > { %259 = vadd.xlane.f32.xlu1 %v258_v14  ;;  %235 = vadd.xlane.f32.xlu0 %v234_v15  ;;  %p1130_p7 = pnand %p1129_p3, %p1123_p8 }
  0x67   : > { %262 = vadd.xlane.f32.xlu1 %v261_v18  ;;  %238 = vadd.xlane.f32.xlu0 %v237_v19 }
  0x6b   : > { %265 = vadd.xlane.f32.xlu1 %v264_v22  ;;  %241 = vadd.xlane.f32.xlu0 %v240_v23 }
  0x6f   : > { %268 = vadd.xlane.f32.xlu1 %v267_v26  ;;  %244 = vadd.xlane.f32.xlu0 %v243_v27 }
  0x73   : > { %271 = vadd.xlane.f32.xlu1 %v270_v30  ;;  %247 = vadd.xlane.f32.xlu0 %v246_v31 }
  0xe4   : > { %v230_v32 = vpop.xlane.xlu1 %229  ;;  %v227_v33 = vpop.xlane.xlu0 %226 }
  0xe8   : > { %v254_v34 = vpop.xlane.xlu1 %253  ;;  %v251_v35 = vpop.xlane.xlu0 %250 }
  0xe9   : > { %v274_v36 = vadd.f32 %v254_v34, %v230_v32  ;;  %v273_v37 = vadd.f32 %v251_v35, %v227_v33 }
  0xeb   : > { %v282_v38 = vmul.f32 0.0078125, %v274_v36  ;;  %v281_v39 = vmul.f32 0.0078125, %v273_v37 }
  0xec   : > { %v257_v40 = vpop.xlane.xlu1 %256  ;;  %v233_v41 = vpop.xlane.xlu0 %232 }
  0xed   : > { %v1443_v42 = vsub.f32 %v208_v0, %v282_v38  ;;  %v1445_v43 = vsub.f32 %v825_v2, %v282_v38  ;;  %v1447_v44 = vsub.f32 %v207_v1, %v281_v39  ;;  %v1449_v45 = vsub.f32 %v824_v5, %v281_v39 }
  0xee   : > { %v275_v46 = vadd.f32 %v257_v40, %v233_v41 }
  0xef   : > { %v337_v47 = vmul.f32 %v1449_v45, %v1449_v45  ;;  %v305_v48 = vmul.f32 %v1447_v44, %v1447_v44  ;;  %v338_v52 = vmul.f32 %v1445_v43, %v1445_v43  ;;  %v306_v56 = vmul.f32 %v1443_v42, %v1443_v42 }
  0xf0   : > { %v283_v49 = vmul.f32 0.0078125, %v275_v46  ;;  %v260_v50 = vpop.xlane.xlu1 %259  ;;  %v236_v51 = vpop.xlane.xlu0 %235 }
  0xf1   : > { %v345_v53 = vsel %vm224_vm0, %v337_v47, 0.0  ;;  %v313_v54 = vsel %vm224_vm0, %v305_v48, 0.0  ;;  %v276_v55 = vadd.f32 %v260_v50, %v236_v51  ;;  %v348_v60 = vsel %vm224_vm0, %v338_v52, 0.0  ;;  %v426_v48 = vld [vmem:[#allocation5 + $0x40] sm:$0xff] }
  0xf2   : > { %v1461_v57 = vsub.f32 %v209_v9, %v283_v49  ;;  %v1464_v58 = vsub.f32 %v1387_v8, %v283_v49  ;;  %346 = vadd.xlane.f32.xlu1 %v345_v53  ;;  %314 = vadd.xlane.f32.xlu0 %v313_v54  ;;  %v316_v3 = vsel %vm224_vm0, %v306_v56, 0.0  ;;  %v427_v49 = vld [vmem:[#allocation5 + $0x48] sm:$0xff]  ;;  %v417_v50 = vld [vmem:[#allocation5] sm:$0xff] }
  0xf3   : > { %v284_v59 = vmul.f32 0.0078125, %v276_v55  ;;  %v945_v52 = vpack.c.bf16 %v427_v49, %v426_v48  ;;  %v418_v53 = vld [vmem:[#allocation5 + $0x8] sm:$0xff] }
  0xf4   : > { %v263_v61 = vpop.xlane.xlu1 %262  ;;  %v239_v62 = vpop.xlane.xlu0 %238  ;;  %v339_v63 = vmul.f32 %v1464_v58, %v1464_v58  ;;  %v307_v0 = vmul.f32 %v1461_v57, %v1461_v57  ;;  %v961_v56 = vpack.c.bf16 %v418_v53, %v417_v50 }
  0xf5   : > { %v1472_v1 = vsub.f32 %v1397_v13, %v284_v59  ;;  %v1475_v2 = vsub.f32 %v1394_v12, %v284_v59  ;;  %v277_v4 = vadd.f32 %v263_v61, %v239_v62  ;;  %946 = vmatprep.subr.bf16.mxu1 %v945_v52  ;;  %v429_v59 = vld [vmem:[#allocation5 + $0x58] sm:$0xff] }
  0xf6   : > { %349 = vadd.xlane.f32.xlu1 %v348_v60  ;;  %317 = vadd.xlane.f32.xlu0 %v316_v3  ;;  %v351_v5 = vsel %vm224_vm0, %v339_v63, 0.0  ;;  %v319_v7 = vsel %vm224_vm0, %v307_v0, 0.0  ;;  %v419_v60 = vld [vmem:[#allocation5 + $0x10] sm:$0xff]  ;;  %v420_v62 = vld [vmem:[#allocation5 + $0x18] sm:$0xff] }
  0xf7   : > { %v285_v6 = vmul.f32 0.0078125, %v277_v4  ;;  %v340_v8 = vmul.f32 %v1475_v2, %v1475_v2  ;;  %v308_v9 = vmul.f32 %v1472_v1, %v1472_v1  ;;  %962 = vmatprep.subr.bf16.mxu0 %v961_v56  ;;  %948 = vmatpush3.bf16.msra.mxu1 %v945_v52  ;;  %v965_v3 = vpack.c.bf16 %v420_v62, %v419_v60  ;;  %v430_v4 = vld [vmem:[#allocation5 + $0x60] sm:$0xff] }
  0xf8   : > { %v266_v10 = vpop.xlane.xlu1 %265  ;;  %v242_v11 = vpop.xlane.xlu0 %241  ;;  %964 = vmatpush3.bf16.msra.mxu0 %v961_v56 }
  0xf9   : > { %v1485_v12 = vsub.f32 %v1407_v17, %v285_v6  ;;  %v1488_v13 = vsub.f32 %v1404_v16, %v285_v6  ;;  %v278_v14 = vadd.f32 %v266_v10, %v242_v11  ;;  %v354_v15 = vsel %vm224_vm0, %v340_v8, 0.0  ;;  %966 = vmatprep.subr.bf16.mxu0 %v965_v3  ;;  %v421_v6 = vld [vmem:[#allocation5 + $0x20] sm:$0xff]  ;;  %v422_v8 = vld [vmem:[#allocation5 + $0x28] sm:$0xff]  ;;  %v432_v10 = vld [vmem:[#allocation5 + $0x70] sm:$0xff] }
  0xfa   : > { %352 = vadd.xlane.f32.xlu1 %v351_v5  ;;  %320 = vadd.xlane.f32.xlu0 %v319_v7  ;;  %v322_v19 = vsel %vm224_vm0, %v308_v9, 0.0  ;;  %v431_v5 = vld [vmem:[#allocation5 + $0x68] sm:$0xff]  ;;  %v969_v9 = vpack.c.bf16 %v422_v8, %v421_v6  ;;  %v433_v11 = vld [vmem:[#allocation5 + $0x78] sm:$0xff] }
  0xfb   : > { %v286_v18 = vmul.f32 0.0078125, %v278_v14  ;;  %v341_v22 = vmul.f32 %v1488_v13, %v1488_v13  ;;  %v309_v23 = vmul.f32 %v1485_v12, %v1485_v12  ;;  %v953_v7 = vpack.c.bf16 %v431_v5, %v430_v4  ;;  %v423_v14 = vld [vmem:[#allocation5 + $0x30] sm:$0xff] }
  0xfc   : > { %v269_v26 = vpop.xlane.xlu1 %268  ;;  %v245_v17 = vpop.xlane.xlu0 %244  ;;  %968 = vmatpush3.bf16.msra.mxu0 %v965_v3 }
  0xfd   : > { %v1497_v27 = vsub.f32 %v1417_v21, %v286_v18  ;;  %v1500_v16 = vsub.f32 %v1414_v20, %v286_v18  ;;  %v279_v30 = vadd.f32 %v269_v26, %v245_v17  ;;  %v357_v31 = vsel %vm224_vm0, %v341_v22, 0.0  ;;  %970 = vmatprep.subr.bf16.mxu0 %v969_v9  ;;  %v424_v18 = vld [vmem:[#allocation5 + $0x38] sm:$0xff] }
  0xfe   : > { %355 = vadd.xlane.f32.xlu1 %v354_v15  ;;  %323 = vadd.xlane.f32.xlu0 %v322_v19  ;;  %v325_v33 = vsel %vm224_vm0, %v309_v23, 0.0  ;;  %v957_v15 = vpack.c.bf16 %v433_v11, %v432_v10  ;;  %v973_v19 = vpack.c.bf16 %v424_v18, %v423_v14 }
  0xff   : > { %v287_v32 = vmul.f32 0.0078125, %v279_v30  ;;  %v342_v34 = vmul.f32 %v1500_v16, %v1500_v16  ;;  %v310_v35 = vmul.f32 %v1497_v27, %v1497_v27 }
 0x100   : > { %v272_v36 = vpop.xlane.xlu1 %271  ;;  %v248_v21 = vpop.xlane.xlu0 %247  ;;  %972 = vmatpush3.bf16.msra.mxu0 %v969_v9 }
 0x101   : > { %v1509_v37 = vsub.f32 %v1427_v25, %v287_v32  ;;  %v1512_v20 = vsub.f32 %v1424_v24, %v287_v32  ;;  %v280_v38 = vadd.f32 %v272_v36, %v248_v21  ;;  %v360_v39 = vsel %vm224_vm0, %v342_v34, 0.0  ;;  %974 = vmatprep.subr.bf16.mxu0 %v973_v19 }
 0x102   : > { %358 = vadd.xlane.f32.xlu1 %v357_v31  ;;  %326 = vadd.xlane.f32.xlu0 %v325_v33  ;;  %v328_v41 = vsel %vm224_vm0, %v310_v35, 0.0 }
 0x103   : > { %v288_v40 = vmul.f32 0.0078125, %v280_v38  ;;  %v343_v46 = vmul.f32 %v1512_v20, %v1512_v20  ;;  %v311_v47 = vmul.f32 %v1509_v37, %v1509_v37 }
 0x104   : > { %976 = vmatpush3.bf16.msra.mxu0 %v973_v19 }
 0x105   : > { %v1521_v25 = vsub.f32 %v1437_v29, %v288_v40  ;;  %v1524_v24 = vsub.f32 %v1434_v28, %v288_v40  ;;  %v363_v51 = vsel %vm224_vm0, %v343_v46, 0.0  ;;  %v331_v54 = vsel %vm224_vm0, %v311_v47, 0.0  ;;  %v428_v28 = vld [vmem:[#allocation5 + $0x50] sm:$0xff] }
 0x106   : > { %361 = vadd.xlane.f32.xlu1 %v360_v39  ;;  %329 = vadd.xlane.f32.xlu0 %v328_v41  ;;  %v949_v61 = vpack.c.bf16 %v429_v59, %v428_v28 }
 0x107   : > { %v344_v55 = vmul.f32 %v1524_v24, %v1524_v24  ;;  %v312_v29 = vmul.f32 %v1521_v25, %v1521_v25 }
 0x108   : > { %950 = vmatprep.subr.bf16.mxu1 %v949_v61 }
 0x109   : > { %v366_v63 = vsel %vm224_vm0, %v344_v55, 0.0  ;;  %v334_v0 = vsel %vm224_vm0, %v312_v29, 0.0  ;;  %952 = vmatpush3.bf16.msra.mxu1 %v949_v61 }
 0x10a   : > { %364 = vadd.xlane.f32.xlu1 %v363_v51  ;;  %332 = vadd.xlane.f32.xlu0 %v331_v54 }
 0x10b   : > { %954 = vmatprep.subr.bf16.mxu1 %v953_v7 }
 0x10d   : > { %956 = vmatpush3.bf16.msra.mxu1 %v953_v7 }
 0x10e   : > { %367 = vadd.xlane.f32.xlu1 %v366_v63  ;;  %335 = vadd.xlane.f32.xlu0 %v334_v0 }
 0x10f   : > { %958 = vmatprep.subr.bf16.mxu1 %v957_v15 }
 0x111   : > { %960 = vmatpush3.bf16.msra.mxu1 %v957_v15 }
 0x17f   : > { %v347_v22 = vpop.xlane.xlu1 %346  ;;  %v315_v23 = vpop.xlane.xlu0 %314 }
 0x180   : > { %v369_v26 = vadd.f32 %v347_v22, %v315_v23 }
 0x182   : > { %v377_v17 = vmul.f32 0.0078125, %v369_v26 }
 0x183   : > { %v350_v30 = vpop.xlane.xlu1 %349  ;;  %v318_v31 = vpop.xlane.xlu0 %317 }
 0x184   : > { %v385_v32 = vadd.f32 1e-05, %v377_v17  ;;  %v370_v33 = vadd.f32 %v350_v30, %v318_v31 }
 0x186   : > { %1046 = vrsqrt.f32 %v385_v32  ;;  %v378_v34 = vmul.f32 0.0078125, %v370_v33 }
 0x187   : > { %v353_v35 = vpop.xlane.xlu1 %352  ;;  %v321_v36 = vpop.xlane.xlu0 %320 }
 0x188   : > { %v386_v21 = vadd.f32 1e-05, %v378_v34  ;;  %v371_v38 = vadd.f32 %v353_v35, %v321_v36 }
 0x18a   : > { %1048 = vrsqrt.f32 %v386_v21  ;;  %v379_v39 = vmul.f32 0.0078125, %v371_v38 }
 0x18b   : > { %v356_v40 = vpop.xlane.xlu1 %355  ;;  %v324_v41 = vpop.xlane.xlu0 %323 }
 0x18c   : > { %v387_v46 = vadd.f32 1e-05, %v379_v39  ;;  %v372_v47 = vadd.f32 %v356_v40, %v324_v41 }
 0x18e   : > { %1050 = vrsqrt.f32 %v387_v46  ;;  %v380_v48 = vmul.f32 0.0078125, %v372_v47 }
 0x18f   : > { %v359_v49 = vpop.xlane.xlu1 %358  ;;  %v327_v50 = vpop.xlane.xlu0 %326 }
 0x190   : > { %v1047_v51 = vpop.eup %1046  ;;  %v388_v52 = vadd.f32 1e-05, %v380_v48  ;;  %v373_v53 = vadd.f32 %v359_v49, %v327_v50 }
 0x191   : > { %v409_v54 = vmul.f32 %v1047_v51, %v1449_v45  ;;  %v401_v55 = vmul.f32 %v1047_v51, %v1447_v44 }
 0x192   : > { %1052 = vrsqrt.f32 %v388_v52  ;;  %v381_v29 = vmul.f32 0.0078125, %v373_v53 }
 0x193   : > { %v362_v56 = vpop.xlane.xlu1 %361  ;;  %905 = vmatprep.mubr.msk.f32.mxu1 %vm224_vm0, %v409_v54  ;;  %933 = vmatprep.mubr.msk.f32.mxu0 %vm224_vm0, %v401_v55  ;;  %v330_v28 = vpop.xlane.xlu0 %329 }
 0x194   : > { %v1049_v59 = vpop.eup %1048  ;;  %v389_v60 = vadd.f32 1e-05, %v381_v29  ;;  %v374_v61 = vadd.f32 %v362_v56, %v330_v28 }
 0x195   : > { %v410_v62 = vmul.f32 %v1049_v59, %v1445_v43  ;;  %v402_v63 = vmul.f32 %v1049_v59, %v1443_v42 }
 0x196   : > { %1054 = vrsqrt.f32 %v389_v60  ;;  %v382_v0 = vmul.f32 0.0078125, %v374_v61 }
 0x197   : > { %v365_v45 = vpop.xlane.xlu1 %364  ;;  %906 = vmatmul.mubr.msk.f32.vlgmr.msra.gmra.mrb[0].mxu1 %vm224_vm0, %v410_v62  ;;  %934 = vmatmul.mubr.msk.f32.vlgmr.msra.gmra.mrb[0].mxu0 %vm224_vm0, %v402_v63  ;;  %v333_v44 = vpop.xlane.xlu0 %332 }
 0x198   : > { %v1051_v3 = vpop.eup %1050  ;;  %v390_v4 = vadd.f32 1e-05, %v382_v0  ;;  %v375_v5 = vadd.f32 %v365_v45, %v333_v44 }
 0x199   : > { %v411_v6 = vmul.f32 %v1051_v3, %v1464_v58  ;;  %v403_v7 = vmul.f32 %v1051_v3, %v1461_v57 }
 0x19a   : > { %1056 = vrsqrt.f32 %v390_v4  ;;  %v383_v8 = vmul.f32 0.0078125, %v375_v5 }
 0x19b   : > { %v368_v43 = vpop.xlane.xlu1 %367  ;;  %908 = vmatprep.mubr.msk.f32.mxu1 %vm224_vm0, %v411_v6  ;;  %936 = vmatprep.mubr.msk.f32.mxu0 %vm224_vm0, %v403_v7  ;;  %v336_v42 = vpop.xlane.xlu0 %335 }
 0x19c   : > { %v1053_v9 = vpop.eup %1052  ;;  %v391_v10 = vadd.f32 1e-05, %v383_v8  ;;  %v376_v11 = vadd.f32 %v368_v43, %v336_v42 }
 0x19d   : > { %v412_v14 = vmul.f32 %v1053_v9, %v1475_v2  ;;  %v404_v15 = vmul.f32 %v1053_v9, %v1472_v1 }
 0x19e   : > { %1058 = vrsqrt.f32 %v391_v10  ;;  %v384_v18 = vmul.f32 0.0078125, %v376_v11 }
 0x19f   : > { %909 = vmatmul.mubr.msk.f32.gmra.mrb[2].mxu1 %vm224_vm0, %v412_v14  ;;  %937 = vmatmul.mubr.msk.f32.gmra.mrb[2].mxu0 %vm224_vm0, %v404_v15 }
 0x1a0   : > { %v1055_v57 = vpop.eup %1054  ;;  %v392_v58 = vadd.f32 1e-05, %v384_v18 }
 0x1a1   : > { %v413_v19 = vmul.f32 %v1055_v57, %v1488_v13  ;;  %v405_v22 = vmul.f32 %v1055_v57, %v1485_v12 }
 0x1a2   : > { %1060 = vrsqrt.f32 %v392_v58 }
 0x1a3   : > { %911 = vmatprep.mubr.msk.f32.mxu1 %vm224_vm0, %v413_v19  ;;  %939 = vmatprep.mubr.msk.f32.mxu0 %vm224_vm0, %v405_v22 }
 0x1a4   : > { %v1057_v2 = vpop.eup %1056 }
 0x1a5   : > { %v414_v1 = vmul.f32 %v1057_v2, %v1500_v16  ;;  %v406_v23 = vmul.f32 %v1057_v2, %v1497_v27 }
 0x1a7   : > { %912 = vmatmul.mubr.msk.f32.gmra.mrb[4].mxu1 %vm224_vm0, %v414_v1  ;;  %940 = vmatmul.mubr.msk.f32.gmra.mrb[4].mxu0 %vm224_vm0, %v406_v23 }
 0x1a8   : > { %v1059_v26 = vpop.eup %1058 }
 0x1a9   : > { %v415_v13 = vmul.f32 %v1059_v26, %v1512_v20  ;;  %v407_v12 = vmul.f32 %v1059_v26, %v1509_v37  ;;  %v848_v37 = vld [vmem:[%s1641_s2] ss:$0 sm:$0xff] }
 0x1ab   : > { %914 = vmatprep.mubr.msk.f32.mxu1 %vm224_vm0, %v415_v13  ;;  %942 = vmatprep.mubr.msk.f32.mxu0 %vm224_vm0, %v407_v12 }
 0x1ac   : > { %v1061_v17 = vpop.eup %1060 }
 0x1ad   : > { %v416_v30 = vmul.f32 %v1061_v17, %v1524_v24  ;;  %v408_v16 = vmul.f32 %v1061_v17, %v1521_v25 }
 0x1af   : > { %915 = vmatmul.mubr.msk.f32.gmra.mrb[6].mxu1 %vm224_vm0, %v416_v30  ;;  %943 = vmatmul.mubr.msk.f32.gmra.mrb[6].mxu0 %vm224_vm0, %v408_v16 }
 0x26a   : > { %v907_v27 = vpop.f32.mrb[0].mxu1  ;;  %v935_v31 = vpop.f32.mrb[0].mxu0 }
 0x26b   : > { %v659_v20 = vadd.f32 %v935_v31, %v907_v27  ;;  %v524_v32 = vpop.f32.mrb[1].mxu1  ;;  %v653_v33 = vpop.f32.mrb[1].mxu0 }
 0x26c   : > { %v654_v34 = vadd.f32 %v653_v33, %v524_v32 }
 0x26d   : > { %v700_v35 = vadd.f32 %v848_v37, %v659_v20 }
 0x26e   : > { %v699_v36 = vadd.f32 %v848_v37, %v654_v34 }
 0x26f   : > { %708 = vst.msk [vmem:[%s1570_s9 + $0x8] sm:$0xff] %vm224_vm0, %v700_v35 }
 0x270   : > { %707 = vst.msk [vmem:[%s1570_s9] sm:$0xff] %vm224_vm0, %v699_v36 }
 0x272   : > { %v910_v25 = vpop.f32.mrb[2].mxu1  ;;  %v938_v24 = vpop.f32.mrb[2].mxu0 }
 0x273   : > { %v669_v21 = vadd.f32 %v938_v24, %v910_v25  ;;  %v534_v38 = vpop.f32.mrb[3].mxu1  ;;  %v663_v39 = vpop.f32.mrb[3].mxu0 }
 0x274   : > { %v664_v40 = vadd.f32 %v663_v39, %v534_v38 }
 0x275   : > { %v702_v41 = vadd.f32 %v848_v37, %v669_v21 }
 0x276   : > { %v701_v46 = vadd.f32 %v848_v37, %v664_v40 }
 0x277   : > { %710 = vst.msk [vmem:[%s1570_s9 + $0x18] sm:$0xff] %vm224_vm0, %v702_v41 }
 0x278   : > { %709 = vst.msk [vmem:[%s1570_s9 + $0x10] sm:$0xff] %vm224_vm0, %v701_v46 }
 0x27a   : > { %v913_v47 = vpop.f32.mrb[4].mxu1  ;;  %v941_v48 = vpop.f32.mrb[4].mxu0 }
 0x27b   : > { %v679_v49 = vadd.f32 %v941_v48, %v913_v47  ;;  %v544_v50 = vpop.f32.mrb[5].mxu1  ;;  %v673_v51 = vpop.f32.mrb[5].mxu0 }
 0x27c   : > { %v674_v52 = vadd.f32 %v673_v51, %v544_v50 }
 0x27d   : > { %v704_v53 = vadd.f32 %v848_v37, %v679_v49 }
 0x27e   : > { %v703_v54 = vadd.f32 %v848_v37, %v674_v52 }
 0x27f   : > { %712 = vst.msk [vmem:[%s1570_s9 + $0x28] sm:$0xff] %vm224_vm0, %v704_v53 }
 0x280   : > { %711 = vst.msk [vmem:[%s1570_s9 + $0x20] sm:$0xff] %vm224_vm0, %v703_v54 }
 0x282   : > { %v916_v55 = vpop.f32.mrb[6].mxu1  ;;  %v944_v29 = vpop.f32.mrb[6].mxu0 }
 0x283   : > { %v689_v56 = vadd.f32 %v944_v29, %v916_v55  ;;  %v554_v28 = vpop.f32.mrb[7].mxu1  ;;  %v683_v59 = vpop.f32.mrb[7].mxu0 }
 0x284   : > { %v684_v60 = vadd.f32 %v683_v59, %v554_v28 }
 0x285   : > { %v706_v61 = vadd.f32 %v848_v37, %v689_v56 }
 0x286   : > { %v705_v62 = vadd.f32 %v848_v37, %v684_v60 }
 0x287   : > { %714 = vst.msk [vmem:[%s1570_s9 + $0x38] sm:$0xff] %vm224_vm0, %v706_v61 }
 0x288   : > { %713 = vst.msk [vmem:[%s1570_s9 + $0x30] sm:$0xff] %vm224_vm0, %v705_v62 }
 0x289   : > { %1133 = shalt.err (!%p1130_p7)
}
 0x28a   : > { %s1134_s22 = scalar_lea.hbm %s1589_s27, 1024  ;;  %s1138_s11 = scalar_lea.hbm %s1642_s3, 2048 }
 0x28b   : > { %p1135_p9 = scmp.ne.s32.totalorder %s1589_s27, %s1134_s22  ;;  %p1139_p5 = scmp.lt.u32.totalorder %s1589_s27, %s1642_s3 }
 0x28c   : > { %p1140_p11 = scmp.lt.u32.totalorder %s1138_s11, %s1134_s22  ;;  %p1142_p4 = scmp.lt.u32.totalorder %s1134_s22, %s1589_s27 }
 0x28d   : > { %p1136_p1 = pnand %p1135_p9, %p1313_p12 }
 0x28e   : > { %p1141_p2 = por %p1140_p11, %p1139_p5 }
 0x28f   : > { %p1137_p0 = pneg %p1136_p1 }
 0x290   : > { %p1143_p6 = por %p1142_p4, %p1141_p2 }
 0x292   : > { %p1144_p8 = pnand %p1143_p6, %p1137_p0 }
 0x294   : > { %1147 = shalt.err (!%p1144_p8)
}
 0x295   : > { %s1197_s8 = smov 128   ;;  %s1198_s9 = smov 8  }
 0x296   : > { %991 = dma.vmem_to_hbm [thread:$0]  (%p1313_p12), %s1591_s25, 1024, %s1589_s27, %s716_s16, %s1197_s8, %s1197_s8, %s1198_s9  }
 0x297 PF: > { %s744_s4 = sand.u32 1, %s1178_s12   ;;  %p1657_p10 = scmp.ne.s32.totalorder %s1647_s19, 0 }
 0x298   : > { %p1658_p13 = scmp.ge.s32.totalorder %s1190_s15, 2  ;;  %s745_s26 = scalar_lea.sflag [#allocation4], %s744_s4 }
 0x29a   : > { %p1002_p3 = pnand %p1658_p13, %p1657_p10 }
 0x29c   : > { %1173 = dma.done.wait (!%p1002_p3), %s745_s26, 1024  }
 0x29d   : > { %1175 = vsyncadd (!%p1002_p3), %s745_s26, 4294966272  ;;  %p17_p7 = scmp.ge.s32.totalorder %s1275_s24, 4   ;;  %s1659_s12 = smov %s1182_s13 }
 0x29e   : > { %s1660_s13 = smov %s1186_s14  ;;  %s1661_s14 = smov %s1309_s17 }
 0x29f   : > { %s1662_s15 = smov %s1275_s24  ;;  %19 = sbr.rel (!%p17_p7) target bundleno = 6 (0x6), region = 83 }
 0x2a6   :  { %750 = vsyncpa [#allocation3], 1 }
 0x2a7   :  { %752 = vsyncpa [#allocation3 + $0x1], 1 }
 0x2a8   :  { %753 = vsyncpa [#allocation6], 1 }
 0x2a9   :  { %754 = vsyncpa [#allocation4], 1 }
 0x2aa   :  { %756 = vsyncpa [#allocation4 + $0x1], 1 }

</bundles_post_ra>
